<compile_context>
chip_gen: v7x
topology: tpu7x:2x2x1
jax: 0.10.0
libtpu: 0.0.40
codegen_flags: <defaults>
</compile_context>

<pallas_src>
import functools
import math

import jax
import jax.numpy as jnp
from jax.experimental import pallas as pl
from jax.experimental.pallas import tpu as pltpu

EPS = 1e-7   # matches the torch module's eps


def _chip_vmem_bytes():
    """Physical VMEM of the local TPU (fallback: 128 MiB)."""
    try:
        info = pltpu.get_tpu_info()
        for name in ("vmem_capacity_bytes", "vmem_size_bytes", "vmem_bytes"):
            v = getattr(info, name, None)
            if v:
                return int(v)
    except Exception:
        pass
    return 128 * 1024 * 1024


# ----------------------------------------------------------------------------
# Kernel 1 (fused): student + teacher Embed = Linear + L2 normalize
# ----------------------------------------------------------------------------
def _embed_kernel(x_ref, wT_ref, b_ref, o_ref):
    # x: (b_tile, dim_in), wT: (dim_in, feat), b: (1, feat)
    h = jnp.dot(x_ref[...], wT_ref[...], preferred_element_type=jnp.float32)
    h = h + b_ref[...]
    ssq = jnp.sum(h * h, axis=1, keepdims=True)
    o_ref[...] = h * jax.lax.rsqrt(ssq)      # bare 1/||h||, as torch Normalize(2)


def embed_both(x_s, x_t, wT_s, b_s, wT_t, b_t):
    """Fused student+teacher Embed. Returns (2, B, feat): [0]=embed_s, [1]=embed_t.

    One pallas_call; the size-2 leading grid axis is 'parallel' so it maps onto
    both TensorCores on v7x. Inputs/weights are zero-padded to a common dim_in,
    which leaves the matmul result unchanged.
    """
    B = x_s.shape[0]
    feat = wT_s.shape[1]
    dmax = max(x_s.shape[1], x_t.shape[1])

    def pad_x(x):
        x = jnp.asarray(x, jnp.float32)
        return jnp.pad(x, ((0, 0), (0, dmax - x.shape[1])))

    def pad_w(w):
        return jnp.pad(jnp.asarray(w, jnp.float32), ((0, dmax - w.shape[0]), (0, 0)))

    x_both = jnp.stack([pad_x(x_s), pad_x(x_t)])          # (2, B, dmax)
    wT_both = jnp.stack([pad_w(wT_s), pad_w(wT_t)])       # (2, dmax, feat)
    b_both = jnp.stack([jnp.asarray(b_s, jnp.float32),
                        jnp.asarray(b_t, jnp.float32)])   # (2, 1, feat)

    b_tile = B if B <= 256 else 128
    grid = (2, pl.cdiv(B, b_tile))
    return pl.pallas_call(
        _embed_kernel,
        out_shape=jax.ShapeDtypeStruct((2, B, feat), jnp.float32),
        grid=grid,
        in_specs=[
            pl.BlockSpec((None, b_tile, dmax), lambda s, i: (s, i, 0)),
            pl.BlockSpec((None, dmax, feat), lambda s, i: (s, 0, 0)),
            pl.BlockSpec((None, 1, feat), lambda s, i: (s, 0, 0)),
        ],
        out_specs=pl.BlockSpec((None, b_tile, feat), lambda s, i: (s, i, 0)),
        compiler_params=pltpu.CompilerParams(
            dimension_semantics=("parallel", "parallel")),
    )(x_both, wT_both, b_both)


# ----------------------------------------------------------------------------
# Kernel 2 (fused, both sides): double-buffered in-kernel memory-row gather +
#     exp(<f,mem>/T)/Z + ContrastLoss_v2 (sample_KD='False') -> per-side scalar
# ----------------------------------------------------------------------------
def _crd_contrast_loss_kernel(idx_ref,     # SMEM (B, kpad) int32   (scalar prefetch)
                              f_ref,       # VMEM (B, D) f32        (per-side anchor)
                              mem_hbm,     # HBM  (2*n_data, D) f32 (pl.ANY)
                              loss_ref,    # VMEM (1, 1) f32        (per-side accumulator)
                              mem_buf,     # VMEM (2, B, k_tile, D) f32 double buffer
                              sem,         # DMA semaphores (2,)    one per slot
                              *, P, n_cols, k_tile, n_data, inv_t, inv_z, log_z,
                              c_const, log_mpn, scale):
    side = pl.program_id(0)
    kt = pl.program_id(1)
    n_kt = pl.num_programs(1)
    B, D = f_ref.shape
    nrows = B * k_tile
    base = side * n_data                  # row offset of this side's bank

    def gather_tile(tile_idx, slot, wait):
        # One 512 B row DMA per (b, k); flattened + unrolled to amortise the
        # scalar descriptor-build cost (k_tile is a power of two -> shift/and).
        col0 = tile_idx * k_tile

        def body(i, carry):
            b = i // k_tile
            k = i - b * k_tile
            row = base + idx_ref[b, col0 + k]
            cp = pltpu.make_async_copy(mem_hbm.at[pl.ds(row, 1)],
                                       mem_buf.at[slot, b, pl.ds(k, 1)],
                                       sem.at[slot])
            if wait:
                cp.wait()
            else:
                cp.start()
            return carry

        jax.lax.fori_loop(0, nrows, body, 0, unroll=8)

    slot = jax.lax.rem(kt, 2)

    @pl.when(kt == 0)
    def _():
        loss_ref[...] = jnp.zeros_like(loss_ref)
        gather_tile(0, 0, wait=False)                 # prime slot 0

    @pl.when(kt + 1 < n_kt)
    def _():
        gather_tile(kt + 1, 1 - slot, wait=False)     # prefetch next tile

    gather_tile(kt, slot, wait=True)                  # wait on current slot only

    # VPU multiply + XLU lane reduce (avoids B tiny M=1 MXU matmuls).
    f = f_ref[...]                                    # (B, D)
    mem = mem_buf[slot]                               # (B, k_tile, D)
    s_t = jnp.sum(f[:, None, :] * mem, axis=-1) * inv_t          # scores / T

    # ContrastLoss_v2 (sample_KD='False'), trimmed transcendentals:
    #   log_D1 = s/T - logZ - log(out + c),  log_D0 = log(m*Pn) - log(out + c)
    out = jnp.exp(s_t) * inv_z
    logden = jnp.log(out + c_const)

    col = kt * k_tile + jax.lax.broadcasted_iota(jnp.int32, s_t.shape, 1)
    is_pos = col < P
    is_neg = jnp.logical_and(col >= P, col < n_cols)
    contrib = (jnp.where(is_pos, s_t - log_z - logden, 0.0)
               + jnp.where(is_neg, float(P) * (log_mpn - logden), 0.0))
    # loss = -(sum log_D1 + P * sum log_D0) / (B * P), accumulated over tiles.
    loss_ref[...] = loss_ref[...] + scale * jnp.sum(contrib)


def crd_contrast_loss_both(f_both, mem_flat, sample_idx, *, P, n_data, nce_t, z,
                           k_tile, vmem_limit_bytes):
    """Fused (student, teacher) contrast readout + ContrastLoss_v2.

    f_both:     (2, B, D)         L2-normalised anchors [e_s, e_t]
    mem_flat:   (2*n_data, D)     stacked banks [memory_t ; memory_s]  (HBM)
    sample_idx: (B, P + K) int32  positive indices first, then negatives
    Returns s_loss + t_loss (scalar).
    """
    _, B, D = f_both.shape
    n_cols = sample_idx.shape[1]
    kpad = pl.cdiv(n_cols, k_tile) * k_tile
    if kpad != n_cols:
        # pad with index 0 (a valid row); padded columns are masked in-kernel
        sample_idx = jnp.pad(sample_idx, ((0, 0), (0, kpad - n_cols)))
    n_kt = kpad // k_tile

    m = float(n_cols - P)                 # number of negatives N
    pn = 1.0 / float(n_data)
    kernel = functools.partial(
        _crd_contrast_loss_kernel,
        P=int(P), n_cols=int(n_cols), k_tile=int(k_tile), n_data=int(n_data),
        inv_t=float(1.0 / nce_t), inv_z=float(1.0 / z), log_z=float(math.log(z)),
        c_const=float(m * pn + EPS), log_mpn=float(math.log(m * pn)),
        scale=float(-1.0 / (float(B) * float(P))))

    out = pl.pallas_call(
        kernel,
        out_shape=jax.ShapeDtypeStruct((2, 1, 1), jnp.float32),
        grid_spec=pltpu.PrefetchScalarGridSpec(
            num_scalar_prefetch=1,
            grid=(2, n_kt),
            in_specs=[
                pl.BlockSpec((None, B, D), lambda s, kt, idx: (s, 0, 0)),
                pl.BlockSpec(memory_space=pl.ANY),           # stacked banks, HBM
            ],
            out_specs=pl.BlockSpec((None, 1, 1), lambda s, kt, idx: (s, 0, 0)),
            scratch_shapes=[
                pltpu.VMEM((2, B, k_tile, D), jnp.float32),  # double-buffered rows
                pltpu.SemaphoreType.DMA((2,)),               # one sem per slot
            ],
        ),
        compiler_params=pltpu.CompilerParams(
            dimension_semantics=("parallel", "arbitrary"),
            vmem_limit_bytes=int(vmem_limit_bytes)),
    )(sample_idx.astype(jnp.int32), f_both, mem_flat)
    return jnp.sum(out)


# ----------------------------------------------------------------------------
# CRDLoss wrapper (parameters initialised deterministically in-script)
# ----------------------------------------------------------------------------
class CRDLossPallas:
    def __init__(self, key, *, s_dim, t_dim, feat_dim, n_data, nce_p2, nce_t,
                 k_tile=None):
        self.P2 = int(nce_p2)
        self.n_data = int(n_data)
        self.nce_t = float(nce_t)
        self.feat_dim = int(feat_dim)
        # TODO(synk): CRD estimates Z from the first batch; fixed to n_data here.
        self.Z = float(n_data)

        self.vmem_bytes = _chip_vmem_bytes()
        if k_tile is None:
            # 64 MiB-VMEM parts (v7x): cap at 256; 128 MiB parts (v5e/v6e): 512.
            k_tile = 256 if self.vmem_bytes <= 64 * 1024 * 1024 else 512
        self.k_tile = int(k_tile)

        ks = jax.random.split(key, 6)
        # Embed params stored pre-transposed (dim_in, feat_dim): hoists the
        # per-call transpose out of the forward path.
        self.wT_s = (jax.random.normal(ks[0], (s_dim, feat_dim), jnp.float32)
                     * (1.0 / jnp.sqrt(s_dim)))
        self.b_s = jax.random.normal(ks[1], (1, feat_dim), jnp.float32) * 0.01
        self.wT_t = (jax.random.normal(ks[2], (t_dim, feat_dim), jnp.float32)
                     * (1.0 / jnp.sqrt(t_dim)))
        self.b_t = jax.random.normal(ks[3], (1, feat_dim), jnp.float32) * 0.01
        # Memory banks (L2-normalised rows); stacked so both sides share one
        # contrast call: rows [0, n_data) = memory_t (student anchors),
        # rows [n_data, 2*n_data) = memory_s (teacher anchors). Stay in HBM.
        mem_s = jax.random.normal(ks[4], (n_data, feat_dim), jnp.float32)
        mem_t = jax.random.normal(ks[5], (n_data, feat_dim), jnp.float32)
        mem_s = mem_s / jnp.linalg.norm(mem_s, axis=1, keepdims=True)
        mem_t = mem_t / jnp.linalg.norm(mem_t, axis=1, keepdims=True)
        self.mem_both = jnp.concatenate([mem_t, mem_s], axis=0)  # (2*n_data, feat)

    def __call__(self, f_s, f_t, idx, contrast_idx):
        B = f_s.shape[0]
        # Fused student+teacher embed (one pallas_call, 2-way parallel axis)
        e_both = embed_both(f_s, f_t, self.wT_s, self.b_s, self.wT_t, self.b_t)

        # positives first, then negatives — matches x.narrow(1, 0, P) in the loss
        sample_idx = jnp.concatenate([idx, contrast_idx], axis=1).astype(jnp.int32)
        n_cols = sample_idx.shape[1]
        # Clip the column tile to the (128-padded) contrast width.
        k_tile = max(128, min(self.k_tile, pl.cdiv(n_cols, 128) * 128))

        # Double-buffered gather + elementwise temps, with headroom, capped to
        # this chip's physical VMEM.
        need = 4 * (2 * B * k_tile * self.feat_dim        # mem_buf
                    + 2 * B * k_tile * self.feat_dim      # compute temps
                    + 4 * B * self.feat_dim) + (4 << 20)
        vmem_limit = min(max(32 << 20, need), int(self.vmem_bytes * 0.9))

        return crd_contrast_loss_both(
            e_both, self.mem_both, sample_idx,
            P=self.P2, n_data=self.n_data, nce_t=self.nce_t, z=self.Z,
            k_tile=k_tile, vmem_limit_bytes=vmem_limit)


# ----------------------------------------------------------------------------
# Pure-JAX reference of the same forward pass (for verification)
# ----------------------------------------------------------------------------
def crd_reference(model, f_s, f_t, idx, contrast_idx):
    def l2norm(h):
        return h / jnp.sqrt(jnp.sum(h * h, axis=1, keepdims=True))

    e_s = l2norm(jnp.asarray(f_s, jnp.float32) @ model.wT_s + model.b_s)
    e_t = l2norm(jnp.asarray(f_t, jnp.float32) @ model.wT_t + model.b_t)
    sample_idx = jnp.concatenate([idx, contrast_idx], axis=1)

    def contrast_out(e, bank):
        rows = bank[sample_idx]                                    # (B, P+K, D)
        s = jnp.sum(e[:, None, :] * rows, axis=-1) / model.nce_t
        return jnp.exp(s) / model.Z

    def contrast_loss(x, P):
        B = x.shape[0]
        N = x.shape[1] - P
        pn = 1.0 / float(model.n_data)
        pos = x[:, :P]
        neg = x[:, P:]
        log_d1 = jnp.log(pos / (pos + N * pn + EPS))
        log_d0 = jnp.log((N * pn) / (neg + N * pn + EPS))
        return -(jnp.sum(log_d1) + P * jnp.sum(log_d0)) / (B * P)

    memory_t = model.mem_both[:model.n_data]
    memory_s = model.mem_both[model.n_data:]
    out_s = contrast_out(e_s, memory_t)
    out_t = contrast_out(e_t, memory_s)
    return contrast_loss(out_s, model.P2) + contrast_loss(out_t, model.P2)


if __name__ == "__main__":
    key = jax.random.PRNGKey(0)
    # Small but representative shapes: feat_dim lane-dense (128); P2 + K = 192
    # contrast columns; k_tile=128 forces 2 column tiles so the double-buffered
    # gather / prefetch path is exercised (the default k_tile is chip-dependent).
    B, s_dim, t_dim, feat_dim = 8, 32, 48, 128
    n_data, P2, n_neg, nce_t = 512, 2, 190, 0.07

    k1, k2, k3, k4, k5 = jax.random.split(key, 5)
    f_s = jax.random.normal(k1, (B, s_dim), jnp.float32)
    f_t = jax.random.normal(k2, (B, t_dim), jnp.float32)
    idx = jax.random.randint(k3, (B, P2), 0, n_data)              # positive indices
    contrast_idx = jax.random.randint(k4, (B, n_neg), 0, n_data)  # negative indices

    model = CRDLossPallas(k5, s_dim=s_dim, t_dim=t_dim, feat_dim=feat_dim,
                          n_data=n_data, nce_p2=P2, nce_t=nce_t, k_tile=128)

    loss = jax.block_until_ready(model(f_s, f_t, idx, contrast_idx))
    assert jnp.isfinite(loss), f"loss not finite: {loss}"

    ref = jax.block_until_ready(crd_reference(model, f_s, f_t, idx, contrast_idx))
    assert jnp.allclose(loss, ref, rtol=1e-2, atol=1e-2), (loss, ref)

    print("KERNEL_OK")
</pallas_src>

<mosaic_0001>
module attributes {stable_mosaic.version = 11 : i64} {
  func.func @_embed_kernel(%arg0: i32, %arg1: i32, %arg2: memref<1x8x48xf32, #tpu.memory_space<vmem>>, %arg3: memref<1x48x128xf32, #tpu.memory_space<vmem>>, %arg4: memref<1x1x128xf32, #tpu.memory_space<vmem>>, %arg5: memref<1x8x128xf32, #tpu.memory_space<vmem>>) attributes {dimension_semantics = [#tpu.dimension_semantics<parallel>, #tpu.dimension_semantics<parallel>], iteration_bounds = array<i64: 2, 1>, scalar_prefetch = 0 : i64, scratch_operands = 0 : i64, tpu.core_type = #tpu.core_type<tc>, window_params = [{transform_indices = @transform_0, window_bounds = array<i64: 1, 8, 48>}, {transform_indices = @transform_1, window_bounds = array<i64: 1, 48, 128>}, {transform_indices = @transform_2, window_bounds = array<i64: 1, 1, 128>}, {transform_indices = @transform_3, window_bounds = array<i64: 1, 8, 128>}]} {
    %c0 = arith.constant 0 : index
    %c0_0 = arith.constant 0 : index
    %c0_1 = arith.constant 0 : index
    %0 = vector.load %arg2[%c0, %c0_0, %c0_1] : memref<1x8x48xf32, #tpu.memory_space<vmem>>, vector<1x8x48xf32>
    %1 = vector.shape_cast %0 : vector<1x8x48xf32> to vector<8x48xf32>
    %c0_2 = arith.constant 0 : index
    %c0_3 = arith.constant 0 : index
    %c0_4 = arith.constant 0 : index
    %2 = vector.load %arg3[%c0_2, %c0_3, %c0_4] : memref<1x48x128xf32, #tpu.memory_space<vmem>>, vector<1x48x128xf32>
    %3 = vector.shape_cast %2 : vector<1x48x128xf32> to vector<48x128xf32>
    %cst = arith.constant dense<0.000000e+00> : vector<8x128xf32>
    %4 = tpu.matmul %1, %3, %cst {dimension_numbers = #tpu.dot_dimension_numbers<[1], [0], [0], [1], [0, 0, 1, 1], [], []>} : vector<8x48xf32>, vector<48x128xf32>, vector<8x128xf32> -> vector<8x128xf32>
    %c0_5 = arith.constant 0 : index
    %c0_6 = arith.constant 0 : index
    %c0_7 = arith.constant 0 : index
    %5 = vector.load %arg4[%c0_5, %c0_6, %c0_7] : memref<1x1x128xf32, #tpu.memory_space<vmem>>, vector<1x1x128xf32>
    %6 = vector.shape_cast %5 : vector<1x1x128xf32> to vector<1x128xf32>
    %7 = vector.broadcast %6 : vector<1x128xf32> to vector<8x128xf32>
    %8 = arith.addf %4, %7 : vector<8x128xf32>
    %9 = arith.mulf %8, %8 : vector<8x128xf32>
    %cst_8 = arith.constant dense<0.000000e+00> : vector<8xf32>
    %10 = vector.multi_reduction <add>, %9, %cst_8 [1] : vector<8x128xf32> to vector<8xf32>
    %11 = vector.shape_cast %10 : vector<8xf32> to vector<8x1xf32>
    %12 = math.rsqrt %11 : vector<8x1xf32>
    %13 = vector.broadcast %12 : vector<8x1xf32> to vector<8x128xf32>
    %14 = arith.mulf %8, %13 : vector<8x128xf32>
    %c0_9 = arith.constant 0 : index
    %c0_10 = arith.constant 0 : index
    %c0_11 = arith.constant 0 : index
    %15 = vector.load %arg5[%c0_9, %c0_10, %c0_11] : memref<1x8x128xf32, #tpu.memory_space<vmem>>, vector<1x8x128xf32>
    %16 = vector.shape_cast %15 : vector<1x8x128xf32> to vector<8x128xf32>
    %17 = vector.shape_cast %14 : vector<8x128xf32> to vector<1x8x128xf32>
    tpu.vector_store %arg5[%c0_9, %c0_10, %c0_11], %17 {strides = array<i32>} : memref<1x8x128xf32, #tpu.memory_space<vmem>>, vector<1x8x128xf32>,
    return
  }
  func.func @transform_0(%arg0: i32, %arg1: i32) -> (i32, i32, i32) {
    %c0_i32 = arith.constant 0 : i32
    %c0_i32_0 = arith.constant 0 : i32
    return %arg0, %arg1, %c0_i32 : i32, i32, i32
  }
  func.func @transform_1(%arg0: i32, %arg1: i32) -> (i32, i32, i32) {
    %c0_i32 = arith.constant 0 : i32
    %c0_i32_0 = arith.constant 0 : i32
    %c0_i32_1 = arith.constant 0 : i32
    return %arg0, %c0_i32, %c0_i32_0 : i32, i32, i32
  }
  func.func @transform_2(%arg0: i32, %arg1: i32) -> (i32, i32, i32) {
    %c0_i32 = arith.constant 0 : i32
    %c0_i32_0 = arith.constant 0 : i32
    %c0_i32_1 = arith.constant 0 : i32
    return %arg0, %c0_i32, %c0_i32_0 : i32, i32, i32
  }
  func.func @transform_3(%arg0: i32, %arg1: i32) -> (i32, i32, i32) {
    %c0_i32 = arith.constant 0 : i32
    %c0_i32_0 = arith.constant 0 : i32
    return %arg0, %arg1, %c0_i32 : i32, i32, i32
  }
}

</mosaic_0001>

<bundles_post_ra>
// kernel: tpu_custom_call.1
= control target key start
LH: loop header
LB: loop body
LE: loop exit
PB: predicated region body
PF: predicated region fallthrough
CT: control target
= control target key end

     0   :  { %8 = vsyncpa [#allocation3], 0  ;;  %s1010_s0 = inlined_call_operand.hbm [shape: f32[2,8,48], index: 0, kind: input, shape index: {}]   ;;  %s1011_s1 = inlined_call_operand.hbm [shape: f32[2,48,128], index: 1, kind: input, shape index: {}]   ;;  %s1012_s2 = inlined_call_operand.vmem [shape: f32[2,1,128], index: 2, kind: input, shape index: {}]   ;;  %s1013_s3 = inlined_call_operand.hbm [shape: f32[2,8,128], index: 3, kind: output, shape index: {}]  }
   0x1   :  { %10 = vsyncpa [#allocation3 + $0x1], 0 }
   0x2   :  { %11 = vsyncpa [#allocation6], 0 }
   0x3   :  { %13 = vsyncpa [#allocation6 + $0x1], 0 }
   0x4   :  { %14 = vsyncpa [#allocation4], 0 }
   0x5   :  { %16 = vsyncpa [#allocation4 + $0x1], 0  ;;  %s778_s12 = smov 0   ;;  %s780_s13 = smov 0  }
   0x6   :  { %s782_s14 = smov 0   ;;  %s784_s15 = smov 0  }
   0x7   :  { %s786_s16 = smov 0   ;;  %s788_s17 = smov 0  }
   0x8 LB: > { %s478_s18 = sadd.s32 4294967295, %s748_s17   ;;  %s479_s19 = sadd.s32 4294967294, %s748_s17   ;;  %s748_s17 = sphi %s788_s17, %s22_s17   ;;  %s744_s16 = sphi %s786_s16, %s1032_s16   ;;  %s740_s15 = sphi %s784_s15, %s1031_s15   ;;  %s736_s14 = sphi %s782_s14, %s1030_s14   ;;  %s732_s13 = sphi %s780_s13, %s1029_s13   ;;  %s728_s12 = sphi %s778_s12, %s1028_s12  }
   0x9   : > { %s34_s20 = sadd.s32 1, %s744_s16  ;;  %s43_s21 = sadd.s32 1, %s736_s14 }
   0xa   : > { %p36_p0 = scmp.ge.s32.totalorder %s34_s20, 2  ;;  %p50_p1 = scmp.ne.s32.totalorder %s736_s14, %s732_s13 }
   0xb   : > { %p51_p2 = scmp.eq.s32.totalorder %s748_s17, 0  ;;  %p56_p3 = scmp.ne.s32.totalorder %s732_s13, %s728_s12 }
   0xc   : > { %s1034_s20 = smov (%p36_p0, %s34_s20), 0  ;;  %p57_p5 = scmp.eq.s32.totalorder %s478_s18, 0 }
   0xd   : > { %p819_p4 = por %p51_p2, %p50_p1  ;;  %s38_s23 = ssub.s32 %s744_s16, %s1034_s20 }
   0xe   : > { %p134_p6 = scmp.eq.s32.totalorder %s478_s18, 1  ;;  %p41_p7 = scmp.eq.s32.totalorder %s38_s23, 0 }
   0xf   : > { %p825_p8 = por %p57_p5, %p56_p3  ;;  %p140_p10 = scmp.eq.s32.totalorder %s479_s19, 1 }
  0x10   : > { %p829_p9 = por %p134_p6, %p50_p1  ;;  %p545_p13 = scmp.lt.s32.totalorder %s748_s17, 2 }
  0x11   : > { %s1017_s24 = scalar_select %p825_p8, 1, 0 }
  0x12   : > { %s1018_s25 = scalar_select %p829_p9, 1, 0 }
  0x13   : > { %s834_s26 = scalar_select %p41_p7, %s736_s14, %s43_s21  }
  0x14   : > { %p836_p11 = por %p140_p10, %p56_p3  ;;  %s843_s28 = sand.u32 1, %s736_s14  }
  0x15   : > { %s482_s29 = sshll.u32 %s843_s28, 3  ;;  %s483_s30 = sshll.u32 %s744_s16, 7 }
  0x16   : > { %s1019_s27 = scalar_select %p836_p11, 1, 0 }
  0x17   : > { %s850_s6 = scalar_lea.hbm %s1010_s0, %s483_s30  ;;  %s164_s7 = scalar_lea.vmem [#allocation2], %s482_s29 }
  0x18   : > { %s172_s8 = sshll.u32 %s164_s7, 4  ;;  %p856_p0 = pnand %p545_p13, %p819_p4  ;;  %s852_s8 = int_to_ptr.vmem [resolvable:$true] %s172_s8 }
  0x19   : > { %s161_s10 = scalar_lea.sflag [#allocation3], %s843_s28  ;;  %s602_s11 = scalar_lea.hbm %s850_s6, 128 }
  0x1a   : > { %p603_p3 = scmp.ne.s32.totalorder %s850_s6, %s602_s11  ;;  %p604_p5 = pneg %p856_p0 }
  0x1b   : > { %s607_s21 = scalar_lea.hbm %s1010_s0, 256  ;;  %p608_p4 = scmp.lt.u32.totalorder %s850_s6, %s1010_s0 }
  0x1c   : > { %p605_p6 = pnand %p604_p5, %p603_p3  ;;  %p609_p10 = scmp.lt.u32.totalorder %s607_s21, %s602_s11 }
  0x1d   : > { %p611_p12 = scmp.lt.u32.totalorder %s602_s11, %s850_s6 }
  0x1e   : > { %p606_p7 = pneg %p605_p6  ;;  %p610_p13 = por %p609_p10, %p608_p4 }
  0x20   : > { %p612_p1 = por %p611_p12, %p610_p13 }
  0x22   : > { %p613_p2 = pnand %p612_p1, %p606_p7 }
  0x24   : > { %616 = shalt.err (!%p613_p2)
}
  0x25   : > { %s617_s29 = scalar_lea.vmem %s852_s8, 128  ;;  %s750_s30 = smov [#allocation2]  }
  0x26   : > { %p618_p3 = scmp.ne.s32.totalorder %s852_s8, %s617_s29  ;;  %s622_s4 = sshll.u32 %s750_s30, 4  ;;  %s623_s4 = int_to_ptr.vmem [resolvable:$false] %s622_s4 }
  0x27   : > { %s624_s5 = scalar_lea.vmem %s623_s4, 256  ;;  %p625_p9 = scmp.lt.s32.totalorder %s852_s8, %s623_s4 }
  0x28   : > { %p620_p6 = pnand %p618_p3, %p604_p5  ;;  %p626_p4 = scmp.lt.s32.totalorder %s624_s5, %s617_s29 }
  0x2a   : > { %p621_p11 = pneg %p620_p6  ;;  %p627_p10 = por %p626_p4, %p625_p9 }
  0x2c   : > { %p628_p12 = pnand %p627_p10, %p621_p11 }
  0x2e   : > { %631 = shalt.err (!%p628_p12)
}
  0x2f   : > { %537 = dma.hbm_to_vmem [thread:$0]  (!%p856_p0), %s850_s6, 128, %s852_s8, %s161_s10  }
  0x30   : > { %p1021_p1 = scmp.lt.s32.totalorder %s748_s17, 3  ;;  %p1022_p2 = scmp.ge.s32.totalorder %s748_s17, 1 }
  0x31   : > { %s525_s11 = smul.u32 48, %s843_s28  ;;  %s180_s6 = scalar_lea.sflag [#allocation6], %s843_s28 }
  0x32   : > { %p892_p7 = pnand %p1022_p2, %p1021_p1  ;;  %s526_s18 = smul.u32 768, %s744_s16 }
  0x33   : > { %s183_s23 = scalar_lea.vmem [#allocation5], %s525_s11  ;;  %s637_s4 = scalar_lea.hbm %s1011_s1, 1536 }
  0x34   : > { %s901_s22 = scalar_lea.hbm %s1011_s1, %s526_s18  ;;  %s190_s29 = sshll.u32 %s183_s23, 4  ;;  %s903_s29 = int_to_ptr.vmem [resolvable:$true] %s190_s29 }
  0x35   : > { %s632_s8 = scalar_lea.hbm %s901_s22, 768  ;;  %p638_p3 = scmp.lt.u32.totalorder %s901_s22, %s1011_s1 }
  0x36   : > { %p633_p9 = scmp.ne.s32.totalorder %s901_s22, %s632_s8  ;;  %p639_p6 = scmp.lt.u32.totalorder %s637_s4, %s632_s8 }
  0x37   : > { %p641_p10 = scmp.lt.u32.totalorder %s632_s8, %s901_s22 }
  0x38   : > { %p635_p11 = pnand %p633_p9, %p604_p5  ;;  %p640_p4 = por %p639_p6, %p638_p3 }
  0x3a   : > { %p636_p13 = pneg %p635_p11  ;;  %p642_p12 = por %p641_p10, %p640_p4 }
  0x3c   : > { %p643_p1 = pnand %p642_p12, %p636_p13 }
  0x3e   : > { %646 = shalt.err (!%p643_p1)
}
  0x3f   : > { %s647_s11 = scalar_lea.vmem %s903_s29, 768  ;;  %s751_s19 = smov [#allocation5]  }
  0x40   : > { %p648_p2 = scmp.ne.s32.totalorder %s903_s29, %s647_s11  ;;  %s652_s21 = sshll.u32 %s751_s19, 4  ;;  %s653_s21 = int_to_ptr.vmem [resolvable:$false] %s652_s21 }
  0x41   : > { %s654_s23 = scalar_lea.vmem %s653_s21, 1536  ;;  %p655_p8 = scmp.lt.s32.totalorder %s903_s29, %s653_s21 }
  0x42   : > { %p650_p9 = pnand %p648_p2, %p604_p5  ;;  %p656_p3 = scmp.lt.s32.totalorder %s654_s23, %s647_s11 }
  0x44   : > { %p651_p11 = pneg %p650_p9  ;;  %p657_p6 = por %p656_p3, %p655_p8 }
  0x46   : > { %p658_p4 = pnand %p657_p6, %p651_p11 }
  0x48   : > { %661 = shalt.err (!%p658_p4)
}
  0x49   : > { %s752_s8 = smov 128   ;;  %s753_s10 = smov 8  }
  0x4a   : > { %540 = dma.hbm_to_vmem [thread:$0]  (!%p856_p0), %s901_s22, 768, %s903_s29, %s180_s6, %s752_s8, %s752_s8, %s753_s10  }
  0x4b   : > { %208 = sbr.rel (%p892_p7) target bundleno = 486 (0x1e6), region = 32  ;;  %s934_s30 = sand.u32 (!%p892_p7), 1, %s732_s13  }
  0x4c   : > { %s486_s4 = sshll.u32 (!%p892_p7), %s934_s30, 3  ;;  %s211_s5 = scalar_lea.sflag (!%p892_p7), [#allocation3], %s934_s30 }
  0x4d   : > { %s214_s18 = scalar_lea.vmem (!%p892_p7), [#allocation2], %s486_s4  ;;  %p1024_p8 = scmp.ne.s32.totalorder (!%p892_p7), %s1017_s24, 0 }
  0x52   : > { %715 = dma.done.wait (%p1024_p8), %s211_s5, 128  }
  0x53   : > { %717 = vsyncadd (%p1024_p8), %s211_s5, 4294967168  ;;  %s527_s28 = smul.u32 48, %s934_s30  ;;  %s220_s9 = scalar_lea.sflag [#allocation6], %s934_s30 }
  0x55   : > { %s223_s7 = scalar_lea.vmem [#allocation5], %s527_s28 }
  0x56   : > { %719 = dma.done.wait (%p1024_p8), %s220_s9, 768  }
  0x57   : > { %721 = vsyncadd (%p1024_p8), %s220_s9, 4294966528  ;;  %v754_v0 = vmov 0.0|0.0   ;;  %vm755_vm0 = vmmov 0   ;;  %v756_v1 = vmov 0.0   ;;  %v258_v2 = vld [vmem:[%s223_s7] sm:$0xff]  ;;  %v259_v3 = vld [vmem:[%s223_s7 + $0x8] sm:$0xff] }
  0x58   : > { %516 = vmatprep.subr.bf16.mxu0 %v754_v0  ;;  %513 = vmatprep.mubr.msk.f32.mxu0 %vm755_vm0, %v756_v1  ;;  %v260_v4 = vld [vmem:[%s223_s7 + $0x10] sm:$0xff]  ;;  %v517_v5 = vpack.c.bf16 %v259_v3, %v258_v2  ;;  %v261_v6 = vld [vmem:[%s223_s7 + $0x18] sm:$0xff]  ;;  %v262_v8 = vld [vmem:[%s223_s7 + $0x20] sm:$0xff]  ;;  %vm271_vm1 = vcmask 392192   ;;  %p254_p0 = scmp.lt.s32.totalorder %s740_s15, 1  ;;  %s491_s11 = sshll.u32 %s740_s15, 7 }
  0x59   : > { %v520_v7 = vpack.c.bf16 %v261_v6, %v260_v4  ;;  %v263_v9 = vld [vmem:[%s223_s7 + $0x28] sm:$0xff]  ;;  %s253_s19 = scalar_lea.vmem [#allocation7], %s486_s4  ;;  %s961_s10 = scalar_lea.hbm %s1013_s3, %s491_s11 }
  0x5a   : > { %518 = vmatpush3.bf16.msra.mxu0 %v517_v5  ;;  %v523_v10 = vpack.c.bf16 %v263_v9, %v262_v8  ;;  %v257_v11 = vld [vmem:[%s214_s18] sm:$0xff]  ;;  %s255_s24 = scalar_select %p254_p0, %s740_s15, 1 }
  0x5b   : > { %519 = vmatprep.subr.bf16.mxu0 %v754_v0  ;;  %s366_s21 = sshll.u32 %s253_s19, 4  ;;  %s352_s5 = scalar_lea.sflag [#allocation4], %s934_s30  ;;  %s963_s21 = int_to_ptr.vmem [resolvable:$true] %s366_s21 }
  0x5c   : > { %s256_s6 = scalar_lea.vmem %s1012_s2, %s255_s24  ;;  %s662_s18 = scalar_lea.vmem %s963_s21, 128 }
  0x5d   : > { %v488_v12 = vld [vmem:[%s256_s6] ss:$0 sm:$0xff]  ;;  %p663_p5 = scmp.ne.s32.totalorder %s963_s21, %s662_s18  ;;  %p1025_p7 = scmp.ne.s32.totalorder %s1018_s25, 0 }
  0x5e   : > { %521 = vmatpush3.bf16.msra.mxu0 %v520_v7  ;;  %s757_s15 = smov [#allocation7]  }
  0x5f   : > { %522 = vmatprep.subr.bf16.mxu0 %v754_v0  ;;  %p664_p13 = pnand %p663_p5, %p1025_p7  ;;  %s666_s4 = sshll.u32 %s757_s15, 4  ;;  %s667_s4 = int_to_ptr.vmem [resolvable:$false] %s666_s4 }
  0x60   : > { %s668_s28 = scalar_lea.vmem %s667_s4, 256  ;;  %p669_p12 = scmp.lt.s32.totalorder %s963_s21, %s667_s4 }
  0x61   : > { %p665_p10 = pneg %p664_p13  ;;  %p670_p1 = scmp.lt.s32.totalorder %s668_s28, %s662_s18 }
  0x62   : > { %524 = vmatpush3.bf16.msra.mxu0 %v523_v10 }
  0x63   : > { %p671_p2 = por %p670_p1, %p669_p12 }
  0x65   : > { %514 = vmatmul.mubr.msk.f32.vlgmr.msra.gmra.mrb[0].mxu0 %vm271_vm1, %v257_v11  ;;  %p672_p9 = pnand %p671_p2, %p665_p10 }
 0x138   : > { %v341_v13 = vpop.f32.mrb[0].mxu0 }
 0x139   : > { %v342_v14 = vadd.f32 %v488_v12, %v341_v13  ;;  %v515_v15 = vpop.f32.mrb[1].mxu0 }
 0x13b   : > { %v345_v16 = vmul.f32 %v342_v14, %v342_v14 }
 0x13d   : > { %346 = vadd.xlane.f32.xlu0 %v345_v16 }
 0x1ca   : > { %v347_v17 = vpop.xlane.xlu0 %346 }
 0x1cb   : > { %600 = vrsqrt.f32 %v347_v17 }
 0x1d5   : > { %v601_v18 = vpop.eup %600 }
 0x1d6   : > { %v349_v19 = vmul.f32 %v601_v18, %v342_v14 }
 0x1d8   : > { %350 = vst [vmem:[%s253_s19] sm:$0xff] %v349_v19 }
 0x1d9   : > { %675 = shalt.err (!%p672_p9)
}
 0x1da   : > { %s676_s30 = scalar_lea.hbm %s961_s10, 128  ;;  %s680_s24 = scalar_lea.hbm %s1013_s3, 256 }
 0x1db   : > { %p677_p11 = scmp.ne.s32.totalorder %s961_s10, %s676_s30  ;;  %p681_p4 = scmp.lt.u32.totalorder %s961_s10, %s1013_s3 }
 0x1dc   : > { %p682_p8 = scmp.lt.u32.totalorder %s680_s24, %s676_s30  ;;  %p684_p5 = scmp.lt.u32.totalorder %s676_s30, %s961_s10 }
 0x1dd   : > { %p678_p3 = pnand %p677_p11, %p1025_p7 }
 0x1de   : > { %p683_p0 = por %p682_p8, %p681_p4 }
 0x1df   : > { %p679_p6 = pneg %p678_p3 }
 0x1e0   : > { %p685_p13 = por %p684_p5, %p683_p0 }
 0x1e2   : > { %p686_p10 = pnand %p685_p13, %p679_p6 }
 0x1e4   : > { %689 = shalt.err (!%p686_p10)
}
 0x1e5   : > { %532 = dma.vmem_to_hbm [thread:$0]  (%p1025_p7), %s963_s21, 128, %s961_s10, %s352_s5  }
 0x1e6 PF: > { %s378_s6 = sand.u32 1, %s728_s12   ;;  %p1026_p12 = scmp.ne.s32.totalorder %s1019_s27, 0 }
 0x1e7   : > { %p1027_p1 = scmp.ge.s32.totalorder %s748_s17, 2  ;;  %s379_s11 = scalar_lea.sflag [#allocation4], %s378_s6 }
 0x1e9   : > { %p542_p2 = pnand %p1027_p1, %p1026_p12 }
 0x1eb   : > { %723 = dma.done.wait (!%p542_p2), %s379_s11, 128  }
 0x1ec   : > { %725 = vsyncadd (!%p542_p2), %s379_s11, 4294967168  ;;  %s22_s17 = sadd.s32 1, %s748_s17   ;;  %s1028_s12 = smov %s732_s13 }
 0x1ed   : > { %p19_p9 = scmp.ge.s32.totalorder %s22_s17, 4   ;;  %s1029_s13 = smov %s736_s14 }
 0x1ee   : > { %s1030_s14 = smov %s834_s26  ;;  %s1031_s15 = smov %s744_s16 }
 0x1ef   : > { %s1032_s16 = smov %s1034_s20  ;;  %21 = sbr.rel (!%p19_p9) target bundleno = 8 (0x8), region = 93 }
 0x1f6   :  { %384 = vsyncpa [#allocation3], 1 }
 0x1f7   :  { %386 = vsyncpa [#allocation3 + $0x1], 1 }
 0x1f8   :  { %387 = vsyncpa [#allocation6], 1 }
 0x1f9   :  { %389 = vsyncpa [#allocation6 + $0x1], 1 }
 0x1fa   :  { %390 = vsyncpa [#allocation4], 1 }
 0x1fb   :  { %392 = vsyncpa [#allocation4 + $0x1], 1 }

</bundles_post_ra>
